<compile_context>
chip_gen: v5e
topology: v5e:2x2
jax: 0.10.0
libtpu: 0.0.40
codegen_flags: <defaults>
</compile_context>

<pallas_src>
import jax
import jax.numpy as jnp
from jax.experimental import pallas as pl
from jax.experimental.pallas import tpu as pltpu

LANE = 128     # lane width (last dim granularity)
SUBLANE = 8    # sublane granularity (second-to-last dim)


def _round_up(x, m):
    return ((x + m - 1) // m) * m


def _make_mlp_kernel(n_hidden):
    """Build a fused MLP kernel for `n_hidden` hidden layers + action head."""

    def kernel(*refs):
        # refs layout: x, (w0, b0), (w1, b1), ..., (w_action, b_action), out
        x_ref = refs[0]
        o_ref = refs[-1]
        h = x_ref[...]
        if h.dtype != jnp.float32:
            h = h.astype(jnp.float32)
        for i in range(n_hidden):
            w = refs[1 + 2 * i][...]
            b = refs[2 + 2 * i][...]
            h = jnp.dot(h, w, preferred_element_type=jnp.float32) + b
            h = jnp.maximum(h, 0.0)          # ReLU
            # dropout (eval mode) -> identity
        wa = refs[1 + 2 * n_hidden][...]
        ba = refs[2 + 2 * n_hidden][...]
        out = jnp.dot(h, wa, preferred_element_type=jnp.float32) + ba
        o_ref[...] = out.astype(o_ref.dtype)

    return kernel


def _pad_params(params):
    """Zero-pad each layer's OUTPUT feature dim to a 128-lane multiple.

    Each layer's input dim is padded to match the (padded) width of the previous
    layer's output; the first layer's input dim stays at the true state_size so
    the activation tensor never has to be padded/copied in HBM.

    Zero padding is exact: padded output lanes are 0 after the bias add, ReLU
    keeps them 0, and the matching zero rows of the next weight ignore them, so
    the final padded action columns are exactly 0 (sliced off in the wrapper).
    """
    padded = []
    prev_out = params[0][0].shape[0]     # true state_size, unpadded
    for (w, b) in params:
        fi, fo = w.shape
        fi_p = prev_out
        fo_p = _round_up(fo, LANE)
        w_p = jnp.zeros((fi_p, fo_p), w.dtype).at[:fi, :fo].set(w)
        b_p = jnp.zeros((1, fo_p), b.dtype).at[:, :fo].set(b)
        padded.append((w_p, b_p))
        prev_out = fo_p
    return padded


def banana_brain_forward(x, params, *, batch_tile=1024):
    """Run the fused MLP Pallas kernel.

    x:       (B, state_size) float32
    params:  list of (W, b) pairs, W is (in, out), b is (1, out).
             The last pair is the action head (no ReLU).
    """
    B, state_size = x.shape
    n_hidden = len(params) - 1
    action_size = params[-1][0].shape[1]

    # --- lane-pad weight output dims to multiples of 128 (exact math, see above) ---
    padded_params = _pad_params(params)
    action_p = padded_params[-1][0].shape[1]

    # --- batch tiling: no batch padding / no HBM copy of x.
    # The grid uses cdiv; Pallas masks the ragged last block's reads/writes.
    tile = min(batch_tile, _round_up(B, SUBLANE))
    grid = (pl.cdiv(B, tile),)
    # TODO(synk): on v7x (2 TCs/chip) prefer an even grid count for large B so
    # both TensorCores get sharded work via the "parallel" batch axis.

    # Input activations: tiled over batch at native feature width (lane-unpadded
    # last dim == full array dim is legal). Weights/biases use constant index
    # maps -> kept resident in VMEM across grid steps.
    in_specs = [pl.BlockSpec((tile, state_size), lambda i: (i, 0))]
    flat_params = []
    for (w, b) in padded_params:
        in_specs.append(pl.BlockSpec(w.shape, lambda i: (0, 0)))
        in_specs.append(pl.BlockSpec(b.shape, lambda i: (0, 0)))
        flat_params.extend([w, b])

    out_spec = pl.BlockSpec((tile, action_p), lambda i: (i, 0))

    # Advisory cost estimate for the XLA scheduler.
    flops = 2 * B * sum(int(w.shape[0]) * int(w.shape[1]) for (w, _) in padded_params)
    param_bytes = sum(int(w.size) * w.dtype.itemsize + int(b.size) * b.dtype.itemsize
                      for (w, b) in padded_params)
    bytes_accessed = (int(x.size) * x.dtype.itemsize
                      + param_bytes
                      + B * action_p * jnp.dtype(x.dtype).itemsize)
    cost = pl.CostEstimate(flops=int(flops), transcendentals=0,
                           bytes_accessed=int(bytes_accessed))

    kernel = _make_mlp_kernel(n_hidden)

    out_p = pl.pallas_call(
        kernel,
        out_shape=jax.ShapeDtypeStruct((B, action_p), x.dtype),
        grid_spec=pltpu.PrefetchScalarGridSpec(
            num_scalar_prefetch=0,
            grid=grid,
            in_specs=in_specs,
            out_specs=out_spec,
        ),
        compiler_params=pltpu.CompilerParams(
            dimension_semantics=("parallel",),
        ),
        cost_estimate=cost,
    )(x, *flat_params)

    # Strip lane padding of the action head.
    return out_p[:, :action_size]


def init_params(key, state_size, hidden_layers, action_size):
    """Deterministic init matching the module's parameter shapes.

    nn.Linear(in, out) has weight (out, in), bias (out,).
    We store W transposed as (in, out) and bias as (1, out) for the kernel.
    """
    sizes = [state_size] + list(hidden_layers) + [action_size]
    params = []
    for i in range(len(sizes) - 1):
        fan_in, fan_out = sizes[i], sizes[i + 1]
        key, kw, kb = jax.random.split(key, 3)
        bound = 1.0 / jnp.sqrt(fan_in)
        w = jax.random.uniform(kw, (fan_in, fan_out), jnp.float32, -bound, bound)
        b = jax.random.uniform(kb, (1, fan_out), jnp.float32, -bound, bound)
        params.append((w, b))
    return params


def reference_forward(x, params):
    """Pure-JAX reference (eval-mode dropout) for correctness checking."""
    h = x
    for (w, b) in params[:-1]:
        h = jnp.maximum(h @ w + b, 0.0)
    w, b = params[-1]
    return h @ w + b


if __name__ == "__main__":
    # Shapes consistent with the module's forward (Banana env):
    #   state_size=37, hidden_layers=[64, 64], action_size=4
    state_size = 37
    hidden_layers = [64, 64]
    action_size = 4

    key = jax.random.PRNGKey(0)
    key, kx = jax.random.split(key)
    params = init_params(key, state_size, hidden_layers, action_size)

    # Case 1: tiny batch -> single grid step (whole batch in one tile).
    batch = 8
    x = jax.random.normal(kx, (batch, state_size), jnp.float32)
    out = jax.block_until_ready(banana_brain_forward(x, params))
    ref = reference_forward(x, params)
    assert out.shape == (batch, action_size), out.shape
    assert jnp.allclose(out, ref, atol=1e-5, rtol=1e-5), "mismatch vs reference (small batch)"

    # Case 2: larger batch that does not divide the tile -> multi-step grid with
    # a ragged (masked) last block; no batch padding or HBM copies of x.
    key, kx2 = jax.random.split(key)
    big_batch = 1000
    x2 = jax.random.normal(kx2, (big_batch, state_size), jnp.float32)
    out2 = jax.block_until_ready(banana_brain_forward(x2, params, batch_tile=256))
    ref2 = reference_forward(x2, params)
    assert out2.shape == (big_batch, action_size), out2.shape
    assert jnp.allclose(out2, ref2, atol=1e-5, rtol=1e-5), "mismatch vs reference (large batch)"

    print("KERNEL_OK")
</pallas_src>

<mosaic_0001>
module attributes {stable_mosaic.version = 11 : i64} {
  func.func @kernel(%arg0: i32, %arg1: memref<8x37xf32, #tpu.memory_space<vmem>>, %arg2: memref<37x128xf32, #tpu.memory_space<vmem>>, %arg3: memref<1x128xf32, #tpu.memory_space<vmem>>, %arg4: memref<128x128xf32, #tpu.memory_space<vmem>>, %arg5: memref<1x128xf32, #tpu.memory_space<vmem>>, %arg6: memref<128x128xf32, #tpu.memory_space<vmem>>, %arg7: memref<1x128xf32, #tpu.memory_space<vmem>>, %arg8: memref<8x128xf32, #tpu.memory_space<vmem>>) attributes {dimension_semantics = [#tpu.dimension_semantics<parallel>], iteration_bounds = array<i64: 1>, scalar_prefetch = 0 : i64, scratch_operands = 0 : i64, tpu.core_type = #tpu.core_type<tc>, window_params = [{transform_indices = @transform_0, window_bounds = array<i64: 8, 37>}, {pipeline_mode = #tpu.pipeline_mode<synchronous>, transform_indices = @transform_1, window_bounds = array<i64: 37, 128>}, {pipeline_mode = #tpu.pipeline_mode<synchronous>, transform_indices = @transform_2, window_bounds = array<i64: 1, 128>}, {pipeline_mode = #tpu.pipeline_mode<synchronous>, transform_indices = @transform_3, window_bounds = array<i64: 128, 128>}, {pipeline_mode = #tpu.pipeline_mode<synchronous>, transform_indices = @transform_4, window_bounds = array<i64: 1, 128>}, {pipeline_mode = #tpu.pipeline_mode<synchronous>, transform_indices = @transform_5, window_bounds = array<i64: 128, 128>}, {pipeline_mode = #tpu.pipeline_mode<synchronous>, transform_indices = @transform_6, window_bounds = array<i64: 1, 128>}, {transform_indices = @transform_7, window_bounds = array<i64: 8, 128>}]} {
    %c0 = arith.constant 0 : index
    %c0_0 = arith.constant 0 : index
    %0 = vector.load %arg1[%c0, %c0_0] : memref<8x37xf32, #tpu.memory_space<vmem>>, vector<8x37xf32>
    %c0_1 = arith.constant 0 : index
    %c0_2 = arith.constant 0 : index
    %1 = vector.load %arg2[%c0_1, %c0_2] : memref<37x128xf32, #tpu.memory_space<vmem>>, vector<37x128xf32>
    %c0_3 = arith.constant 0 : index
    %c0_4 = arith.constant 0 : index
    %2 = vector.load %arg3[%c0_3, %c0_4] : memref<1x128xf32, #tpu.memory_space<vmem>>, vector<1x128xf32>
    %cst = arith.constant dense<0.000000e+00> : vector<8x128xf32>
    %3 = tpu.matmul %0, %1, %cst {dimension_numbers = #tpu.dot_dimension_numbers<[1], [0], [0], [1], [0, 0, 1, 1], [], []>} : vector<8x37xf32>, vector<37x128xf32>, vector<8x128xf32> -> vector<8x128xf32>
    %4 = vector.broadcast %2 : vector<1x128xf32> to vector<8x128xf32>
    %5 = arith.addf %3, %4 : vector<8x128xf32>
    %cst_5 = arith.constant 0.000000e+00 : f32
    %6 = vector.broadcast %cst_5 : f32 to vector<8x128xf32>
    %7 = arith.maximumf %5, %6 : vector<8x128xf32>
    %c0_6 = arith.constant 0 : index
    %c0_7 = arith.constant 0 : index
    %8 = vector.load %arg4[%c0_6, %c0_7] : memref<128x128xf32, #tpu.memory_space<vmem>>, vector<128x128xf32>
    %c0_8 = arith.constant 0 : index
    %c0_9 = arith.constant 0 : index
    %9 = vector.load %arg5[%c0_8, %c0_9] : memref<1x128xf32, #tpu.memory_space<vmem>>, vector<1x128xf32>
    %cst_10 = arith.constant dense<0.000000e+00> : vector<8x128xf32>
    %10 = tpu.matmul %7, %8, %cst_10 {dimension_numbers = #tpu.dot_dimension_numbers<[1], [0], [0], [1], [0, 0, 1, 1], [], []>} : vector<8x128xf32>, vector<128x128xf32>, vector<8x128xf32> -> vector<8x128xf32>
    %11 = vector.broadcast %9 : vector<1x128xf32> to vector<8x128xf32>
    %12 = arith.addf %10, %11 : vector<8x128xf32>
    %cst_11 = arith.constant 0.000000e+00 : f32
    %13 = vector.broadcast %cst_11 : f32 to vector<8x128xf32>
    %14 = arith.maximumf %12, %13 : vector<8x128xf32>
    %c0_12 = arith.constant 0 : index
    %c0_13 = arith.constant 0 : index
    %15 = vector.load %arg6[%c0_12, %c0_13] : memref<128x128xf32, #tpu.memory_space<vmem>>, vector<128x128xf32>
    %c0_14 = arith.constant 0 : index
    %c0_15 = arith.constant 0 : index
    %16 = vector.load %arg7[%c0_14, %c0_15] : memref<1x128xf32, #tpu.memory_space<vmem>>, vector<1x128xf32>
    %cst_16 = arith.constant dense<0.000000e+00> : vector<8x128xf32>
    %17 = tpu.matmul %14, %15, %cst_16 {dimension_numbers = #tpu.dot_dimension_numbers<[1], [0], [0], [1], [0, 0, 1, 1], [], []>} : vector<8x128xf32>, vector<128x128xf32>, vector<8x128xf32> -> vector<8x128xf32>
    %18 = vector.broadcast %16 : vector<1x128xf32> to vector<8x128xf32>
    %19 = arith.addf %17, %18 : vector<8x128xf32>
    %c0_17 = arith.constant 0 : index
    %c0_18 = arith.constant 0 : index
    %20 = vector.load %arg8[%c0_17, %c0_18] : memref<8x128xf32, #tpu.memory_space<vmem>>, vector<8x128xf32>
    tpu.vector_store %arg8[%c0_17, %c0_18], %19 {strides = array<i32>} : memref<8x128xf32, #tpu.memory_space<vmem>>, vector<8x128xf32>,
    return
  }
  func.func @transform_0(%arg0: i32) -> (i32, i32) {
    %c0_i32 = arith.constant 0 : i32
    %c0_i32_0 = arith.constant 0 : i32
    return %arg0, %c0_i32 : i32, i32
  }
  func.func @transform_1(%arg0: i32) -> (i32, i32) {
    %c0_i32 = arith.constant 0 : i32
    %c0_i32_0 = arith.constant 0 : i32
    %c0_i32_1 = arith.constant 0 : i32
    return %c0_i32, %c0_i32_0 : i32, i32
  }
  func.func @transform_2(%arg0: i32) -> (i32, i32) {
    %c0_i32 = arith.constant 0 : i32
    %c0_i32_0 = arith.constant 0 : i32
    %c0_i32_1 = arith.constant 0 : i32
    return %c0_i32, %c0_i32_0 : i32, i32
  }
  func.func @transform_3(%arg0: i32) -> (i32, i32) {
    %c0_i32 = arith.constant 0 : i32
    %c0_i32_0 = arith.constant 0 : i32
    %c0_i32_1 = arith.constant 0 : i32
    return %c0_i32, %c0_i32_0 : i32, i32
  }
  func.func @transform_4(%arg0: i32) -> (i32, i32) {
    %c0_i32 = arith.constant 0 : i32
    %c0_i32_0 = arith.constant 0 : i32
    %c0_i32_1 = arith.constant 0 : i32
    return %c0_i32, %c0_i32_0 : i32, i32
  }
  func.func @transform_5(%arg0: i32) -> (i32, i32) {
    %c0_i32 = arith.constant 0 : i32
    %c0_i32_0 = arith.constant 0 : i32
    %c0_i32_1 = arith.constant 0 : i32
    return %c0_i32, %c0_i32_0 : i32, i32
  }
  func.func @transform_6(%arg0: i32) -> (i32, i32) {
    %c0_i32 = arith.constant 0 : i32
    %c0_i32_0 = arith.constant 0 : i32
    %c0_i32_1 = arith.constant 0 : i32
    return %c0_i32, %c0_i32_0 : i32, i32
  }
  func.func @transform_7(%arg0: i32) -> (i32, i32) {
    %c0_i32 = arith.constant 0 : i32
    %c0_i32_0 = arith.constant 0 : i32
    return %arg0, %c0_i32 : i32, i32
  }
}

</mosaic_0001>

<bundles_post_ra>
// kernel: tpu_custom_call.1
= control target key start
LH: loop header
LB: loop body
LE: loop exit
PB: predicated region body
PF: predicated region fallthrough
CT: control target
= control target key end

     0   :  { %12 = vsyncpa [#allocation3], 0  ;;  %s439_s0 = inlined_call_operand.hbm [shape: f32[8,37], index: 0, kind: input, shape index: {}]   ;;  %s440_s1 = inlined_call_operand.hbm [shape: f32[37,128], index: 1, kind: input, shape index: {}]   ;;  %s441_s2 = inlined_call_operand.vmem [shape: f32[1,128], index: 2, kind: input, shape index: {}]   ;;  %s442_s3 = inlined_call_operand.hbm [shape: f32[128,128], index: 3, kind: input, shape index: {}]   ;;  %s443_s4 = inlined_call_operand.vmem [shape: f32[1,128], index: 4, kind: input, shape index: {}]   ;;  %s444_s5 = inlined_call_operand.hbm [shape: f32[128,128], index: 5, kind: input, shape index: {}]   ;;  %s445_s6 = inlined_call_operand.vmem [shape: f32[1,128], index: 6, kind: input, shape index: {}]   ;;  %s446_s7 = inlined_call_operand.hbm [shape: f32[8,128], index: 7, kind: output, shape index: {}]  }
   0x1   :  { %13 = vsyncpa [#allocation6], 0 }
   0x2   :  { %14 = vsyncpa [#allocation9], 0  ;;  %s31_s26 = sshll.u32 %s440_s1, 4  ;;  %s32_s26 = int_to_ptr.hbm [resolvable:$true] %s31_s26 }
   0x3   :  { %15 = vsyncpa [#allocation4], 0  ;;  %s368_s27 = smov [#allocation5]   ;;  %s21_s8 = sshll.u32 %s439_s0, 4  ;;  %s22_s8 = int_to_ptr.hbm [resolvable:$true] %s21_s8 }
   0x4   :  { %s33_s28 = sshll.u32 %s368_s27, 4  ;;  %s369_s9 = smov 128   ;;  %s34_s28 = int_to_ptr.vmem [resolvable:$true] %s33_s28 }
   0x5   :  { %s370_s10 = smov 8   ;;  %s371_s11 = smov [#allocation2]  }
   0x6   :  { %39 = dma.hbm_to_vmem [thread:$0]  %s32_s26, 640, %s34_s28, [#allocation6], %s369_s9, %s369_s9, %s370_s10  }
   0x7   :  { %s23_s12 = sshll.u32 %s371_s11, 4  ;;  %s46_s15 = sshll.u32 %s442_s3, 4  ;;  %s24_s12 = int_to_ptr.vmem [resolvable:$true] %s23_s12  ;;  %s47_s15 = int_to_ptr.hbm [resolvable:$true] %s46_s15 }
   0x8   :  { %26 = dma.hbm_to_vmem [thread:$0]  %s22_s8, 128, %s24_s12, [#allocation3]  }
   0x9   :  { %s61_s17 = sshll.u32 %s444_s5, 4  ;;  %s372_s18 = smov [#allocation7]   ;;  %s62_s17 = int_to_ptr.hbm [resolvable:$true] %s61_s17 }
   0xa   :  { %s48_s19 = sshll.u32 %s372_s18, 4  ;;  %s373_s0 = smov [#allocation8]   ;;  %s49_s19 = int_to_ptr.vmem [resolvable:$true] %s48_s19 }
   0xb   :  { %54 = dma.hbm_to_vmem [thread:$0]  %s47_s15, 2048, %s49_s19, [#allocation6], %s369_s9, %s369_s9, %s370_s10  }
   0xc   :  { %s63_s20 = sshll.u32 %s373_s0, 4  ;;  %s64_s20 = int_to_ptr.vmem [resolvable:$true] %s63_s20 }
   0xd   :  { %69 = dma.hbm_to_vmem [thread:$0]  %s62_s17, 2048, %s64_s20, [#allocation9], %s369_s9, %s369_s9, %s370_s10  }
   0xe   :  { %360 = dma.done.wait [#allocation3], 128  }
   0xf   :  { %361 = vsyncadd [#allocation3], 4294967168 }
  0x10   :  { %362 = dma.done.wait [#allocation6], 2688  }
  0x11   :  { %363 = vsyncadd [#allocation6], 4294964608 }
  0x12   :  { %364 = dma.done.wait [#allocation9], 2048  }
  0x13   :  { %365 = vsyncadd [#allocation9], 4294965248  ;;  %vm102_vm0 = vcmask 1044480   ;;  %v93_v0 = vld [vmem:[#allocation5 + $0x20] sm:$0x1f]  ;;  %v92_v1 = vld [vmem:[#allocation5 + $0x18] sm:$0xff] }
  0x14   :  { %228 = vmatpush.msk.msra.mxu0 %vm102_vm0, %v93_v0  ;;  %v91_v2 = vld [vmem:[#allocation5 + $0x10] sm:$0xff]  ;;  %v142_v3 = vld [vmem:[#allocation7 + $0x78] sm:$0xff]  ;;  %v141_v4 = vld [vmem:[#allocation7 + $0x70] sm:$0xff]  ;;  %vm98_vm1 = vcmask 302080   ;;  %s374_s24 = smov [#allocation10]   ;;  %s216_s28 = sshll.u32 %s446_s7, 4  ;;  %s217_s28 = int_to_ptr.hbm [resolvable:$true] %s216_s28 }
  0x15   :  { %147 = vmatpush.msra.mxu1 %v142_v3  ;;  %v90_v5 = vld [vmem:[#allocation5 + $0x8] sm:$0xff]  ;;  %v140_v6 = vld [vmem:[#allocation7 + $0x68] sm:$0xff]  ;;  %v89_v7 = vld [vmem:[#allocation5] sm:$0xff]  ;;  %s214_s25 = sshll.u32 %s374_s24, 4  ;;  %s215_s25 = int_to_ptr.vmem [resolvable:$true] %s214_s25 }
  0x16   :  { %118 = vmatpush.msra.mxu0 %v92_v1  ;;  %v139_v8 = vld [vmem:[#allocation7 + $0x60] sm:$0xff]  ;;  %v88_v9 = vld [vmem:[#allocation2] sm:$0xff]  ;;  %v138_v10 = vld [vmem:[#allocation7 + $0x58] sm:$0xff] }
  0x17   :  { %148 = vmatpush.msra.mxu1 %v141_v4  ;;  %v137_v11 = vld [vmem:[#allocation7 + $0x50] sm:$0xff]  ;;  %v136_v12 = vld [vmem:[#allocation7 + $0x48] sm:$0xff]  ;;  %v135_v13 = vld [vmem:[#allocation7 + $0x40] sm:$0xff] }
  0x18   :  { %119 = vmatpush.msra.mxu0 %v91_v2  ;;  %v134_v14 = vld [vmem:[#allocation7 + $0x38] sm:$0xff]  ;;  %v133_v15 = vld [vmem:[#allocation7 + $0x30] sm:$0xff]  ;;  %v132_v16 = vld [vmem:[#allocation7 + $0x28] sm:$0xff] }
  0x19   :  { %149 = vmatpush.msra.mxu1 %v140_v6  ;;  %v131_v17 = vld [vmem:[#allocation7 + $0x20] sm:$0xff]  ;;  %v130_v18 = vld [vmem:[#allocation7 + $0x18] sm:$0xff]  ;;  %v129_v19 = vld [vmem:[#allocation7 + $0x10] sm:$0xff] }
  0x1a   :  { %120 = vmatpush.msra.mxu0 %v90_v5  ;;  %v128_v20 = vld [vmem:[#allocation7 + $0x8] sm:$0xff]  ;;  %v127_v21 = vld [vmem:[#allocation7] sm:$0xff]  ;;  %v183_v22 = vld [vmem:[#allocation8 + $0x78] sm:$0xff] }
  0x1b   :  { %150 = vmatpush.msra.mxu1 %v139_v8  ;;  %v182_v23 = vld [vmem:[#allocation8 + $0x70] sm:$0xff]  ;;  %188 = vmatpush.msra.mxu2 %v183_v22  ;;  %v181_v24 = vld [vmem:[#allocation8 + $0x68] sm:$0xff]  ;;  %v180_v25 = vld [vmem:[#allocation8 + $0x60] sm:$0xff] }
  0x1c   :  { %121 = vmatpush.msra.mxu0 %v89_v7  ;;  %v179_v26 = vld [vmem:[#allocation8 + $0x58] sm:$0xff]  ;;  %v178_v27 = vld [vmem:[#allocation8 + $0x50] sm:$0xff]  ;;  %v177_v28 = vld [vmem:[#allocation8 + $0x48] sm:$0xff] }
  0x1d   :  { %229 = vmatmul.msk.f32.vlgmr.msra.gmra.mxu0 %vm98_vm1, %v88_v9  ;;  %151 = vmatpush.msra.mxu1 %v138_v10  ;;  %v176_v29 = vld [vmem:[#allocation8 + $0x40] sm:$0xff]  ;;  %v175_v30 = vld [vmem:[#allocation8 + $0x38] sm:$0xff]  ;;  %v174_v31 = vld [vmem:[#allocation8 + $0x30] sm:$0xff] }
  0x1e   :  { %189 = vmatpush.msra.mxu2 %v182_v23  ;;  %v173_v32 = vld [vmem:[#allocation8 + $0x28] sm:$0xff]  ;;  %v172_v33 = vld [vmem:[#allocation8 + $0x20] sm:$0xff]  ;;  %v171_v34 = vld [vmem:[#allocation8 + $0x18] sm:$0xff] }
  0x1f   :  { %152 = vmatpush.msra.mxu1 %v137_v11  ;;  %v237_v35 = vld [vmem:[%s441_s2] ss:$0 sm:$0xff]  ;;  %v169_v40 = vld [vmem:[#allocation8 + $0x8] sm:$0xff]  ;;  %v168_v41 = vld [vmem:[#allocation8] sm:$0xff] }
  0x20   :  { %190 = vmatpush.msra.mxu2 %v181_v24  ;;  %v170_v39 = vld [vmem:[#allocation8 + $0x10] sm:$0xff] }
  0x21   :  { %153 = vmatpush.msra.mxu1 %v136_v12  ;;  %v238_v42 = vld [vmem:[%s443_s4] ss:$0 sm:$0xff] }
  0x22   :  { %191 = vmatpush.msra.mxu2 %v180_v25  ;;  %v239_v46 = vld [vmem:[%s445_s6] ss:$0 sm:$0xff] }
  0x23   :  { %154 = vmatpush.msra.mxu1 %v135_v13 }
  0x24   :  { %192 = vmatpush.msra.mxu2 %v179_v26 }
  0x25   :  { %155 = vmatpush.msra.mxu1 %v134_v14 }
  0x26   :  { %193 = vmatpush.msra.mxu2 %v178_v27 }
  0x27   :  { %156 = vmatpush.msra.mxu1 %v133_v15 }
  0x28   :  { %194 = vmatpush.msra.mxu2 %v177_v28 }
  0x29   :  { %157 = vmatpush.msra.mxu1 %v132_v16 }
  0x2a   :  { %195 = vmatpush.msra.mxu2 %v176_v29 }
  0x2b   :  { %158 = vmatpush.msra.mxu1 %v131_v17 }
  0x2c   :  { %196 = vmatpush.msra.mxu2 %v175_v30 }
  0x2d   :  { %159 = vmatpush.msra.mxu1 %v130_v18 }
  0x2e   :  { %197 = vmatpush.msra.mxu2 %v174_v31 }
  0x2f   :  { %160 = vmatpush.msra.mxu1 %v129_v19 }
  0x30   :  { %198 = vmatpush.msra.mxu2 %v173_v32 }
  0x31   :  { %161 = vmatpush.msra.mxu1 %v128_v20 }
  0x32   :  { %199 = vmatpush.msra.mxu2 %v172_v33 }
  0x33   :  { %162 = vmatpush.msra.mxu1 %v127_v21 }
  0x34   :  { %200 = vmatpush.msra.mxu2 %v171_v34 }
  0x36   :  { %201 = vmatpush.msra.mxu2 %v170_v39 }
  0x38   :  { %202 = vmatpush.msra.mxu2 %v169_v40 }
  0x3a   :  { %203 = vmatpush.msra.mxu2 %v168_v41 }
  0x9a   :  { %v123_v36 = vpop.f32.mrf.mxu0 }
  0x9b   :  { %v124_v37 = vadd.f32 %v237_v35, %v123_v36 }
  0x9d   :  { %v126_v38 = vmax.f32 %v124_v37, 0.0 }
  0x9f   :  { %163 = vmatmul.f32.vlgmr.msra.gmra.mxu1 %v126_v38 }
 0x11c   :  { %v164_v43 = vpop.f32.mrf.mxu1 }
 0x11d   :  { %v165_v44 = vadd.f32 %v238_v42, %v164_v43 }
 0x11f   :  { %v167_v45 = vmax.f32 %v165_v44, 0.0 }
 0x121   :  { %204 = vmatmul.f32.vlgmr.msra.gmra.mxu2 %v167_v45 }
 0x1a4   :  { %v205_v47 = vpop.f32.mrf.mxu2 }
 0x1a5   :  { %v206_v48 = vadd.f32 %v239_v46, %v205_v47 }
 0x1a7   :  { %208 = vst [vmem:[#allocation10] sm:$0xff] %v206_v48 }
 0x1a8   :  { %219 = dma.vmem_to_hbm [thread:$0]  %s215_s25, 128, %s217_s28, [#allocation4]  }
 0x1a9   :  { %366 = dma.done.wait [#allocation4], 128  }
 0x1aa   :  { %367 = vsyncadd [#allocation4], 4294967168 }
 0x1ab   :  { %224 = vsyncpa [#allocation3], 1 }
 0x1ac   :  { %225 = vsyncpa [#allocation6], 1 }
 0x1ad   :  { %226 = vsyncpa [#allocation9], 1 }
 0x1ae   :  { %227 = vsyncpa [#allocation4], 1 }

</bundles_post_ra>
